<compile_context>
chip_gen: v7x
topology: tpu7x:2x2x1
jax: 0.10.0
libtpu: 0.0.40
codegen_flags: <defaults>
</compile_context>

<pallas_src>
import jax
import jax.numpy as jnp
from jax.experimental import pallas as pl
from jax.experimental.pallas import tpu as pltpu

_MAX_TB = 65536          # samples per tile: (16, 65536) f32 x-buffer = 4 MiB, 2x buffered
_MIN_PALLAS_BATCH = 2048  # below this, plain XLA beats a custom-call round trip


def _linear_sigmoid_kernel(xt_ref, w_ref, b_ref, o_ref):
    xt = xt_ref[...].astype(jnp.float32)     # (F, TB)  lane-dense tile (bf16 ok)
    w = w_ref[...].astype(jnp.float32)       # (F, 1)   resident weight, lane-broadcast
    b = b_ref[0, 0]                          # scalar bias from SMEM
    # VPU broadcast-mul + sublane reduce over the feature axis -> (1, TB) lane-dense.
    logits = jnp.sum(xt * w, axis=0, keepdims=True) + b
    o_ref[...] = jax.nn.sigmoid(logits).astype(o_ref.dtype)   # unmasked (1, TB) store


def _round_up(n, m):
    return ((n + m - 1) // m) * m


def _pick_tb(batch):
    """Tile size along the batch/lane axis."""
    if batch <= 1024:
        # Single tile; block == full array, so no 128-divisibility requirement.
        return max(batch, 1)
    # >= 4 tiles so the parallel grid balances across 2 TensorCores (v7x), capped so
    # the double-buffered (16, TB) f32 x-tile stays a few MiB.  Multiple of 128 keeps
    # the (1, TB) output block legal against the unpadded (1, B) output.
    tb = min(_MAX_TB, _round_up(pl.cdiv(batch, 4), 128))
    return max(tb, 128)


def linear_claim_classifier_xt(xt, weight, bias):
    """Pallas path on pre-transposed features.

    xt:     (F, B) float32 or bfloat16 (x^T; transpose ideally fused upstream)
    weight: nn.Linear weight, any shape with F elements (e.g. (1, F))
    bias:   nn.Linear bias, 1 element
    returns (1, B) float32 probabilities
    """
    F, B = xt.shape
    TB = _pick_tb(B)
    grid = (pl.cdiv(B, TB),)

    w_col = jnp.asarray(weight, jnp.float32).reshape(F, 1)
    b_smem = jnp.asarray(bias, jnp.float32).reshape(1, 1)

    return pl.pallas_call(
        _linear_sigmoid_kernel,
        out_shape=jax.ShapeDtypeStruct((1, B), jnp.float32),
        grid=grid,
        in_specs=[
            pl.BlockSpec((F, TB), lambda i: (0, i)),              # batch-tiled x^T
            pl.BlockSpec((F, 1), lambda i: (0, 0)),               # resident weight
            pl.BlockSpec(memory_space=pltpu.MemorySpace.SMEM),    # scalar bias
        ],
        out_specs=pl.BlockSpec((1, TB), lambda i: (0, i)),
        compiler_params=pltpu.CompilerParams(
            dimension_semantics=("parallel",),
            vmem_limit_bytes=32 * 1024 * 1024,
        ),
    )(xt, w_col, b_smem)


def linear_claim_classifier(x, weight, bias, *, min_pallas_batch=_MIN_PALLAS_BATCH):
    """Forward pass of LinearClaimClassifier: sigmoid(x @ W^T + b).

    x:      (B, F) float32 (bfloat16 also accepted; upcast in-kernel)
    weight: (1, F) float32 (nn.Linear weight)
    bias:   (1,)   float32 (nn.Linear bias)
    returns (B, 1) float32 probabilities
    """
    B, F = x.shape
    w_col = jnp.asarray(weight, jnp.float32).reshape(F, 1)
    b = jnp.asarray(bias, jnp.float32).reshape(())

    if B < min_pallas_batch:
        # Tiny-B fast path: XLA fuses this cheaper than a custom-call round trip.
        return jax.nn.sigmoid(x.astype(jnp.float32) @ w_col + b)

    # One transpose pass to present a lane-dense (F, B) slab to the kernel; callers
    # that can produce x^T upstream should use linear_claim_classifier_xt directly.
    probs = linear_claim_classifier_xt(x.T, weight, bias)      # (1, B)
    return probs.reshape(B, 1)                                 # metadata-only reshape


def init_params(key, variables=9):
    # Deterministic init mimicking nn.Linear default (uniform +/- 1/sqrt(fan_in)).
    kw, kb = jax.random.split(key)
    bound = 1.0 / jnp.sqrt(jnp.float32(variables))
    weight = jax.random.uniform(kw, (1, variables), jnp.float32, -bound, bound)
    bias = jax.random.uniform(kb, (variables,), jnp.float32, -bound, bound)[:1]
    return weight, bias


if __name__ == "__main__":
    variables = 9

    key = jax.random.PRNGKey(0)
    kx, kp, kx2 = jax.random.split(key, 3)
    weight, bias = init_params(kp, variables)

    # Small batch, forced through the Pallas path (single full-array tile).
    batch = 32
    x = jax.random.normal(kx, (batch, variables), dtype=jnp.float32)
    out = jax.block_until_ready(
        linear_claim_classifier(x, weight, bias, min_pallas_batch=0))
    ref = jax.nn.sigmoid(x @ weight.T + bias[None, :])
    assert out.shape == (batch, 1)
    assert jnp.allclose(out, ref, atol=1e-5, rtol=1e-5)

    # Larger ragged batch: multi-tile parallel grid + masked boundary block,
    # unpadded input/output.
    batch2 = 3000
    x2 = jax.random.normal(kx2, (batch2, variables), dtype=jnp.float32)
    out2 = jax.block_until_ready(linear_claim_classifier(x2, weight, bias))
    ref2 = jax.nn.sigmoid(x2 @ weight.T + bias[None, :])
    assert out2.shape == (batch2, 1)
    assert jnp.allclose(out2, ref2, atol=1e-5, rtol=1e-5)

    # Tiny-batch fast path (plain XLA) keeps identical semantics.
    out3 = jax.block_until_ready(linear_claim_classifier(x, weight, bias))
    assert out3.shape == (batch, 1)
    assert jnp.allclose(out3, ref, atol=1e-5, rtol=1e-5)

    print("KERNEL_OK")
</pallas_src>

<mosaic_0001>
module attributes {stable_mosaic.version = 11 : i64} {
  func.func @_linear_sigmoid_kernel(%arg0: i32, %arg1: memref<9x32xf32, #tpu.memory_space<vmem>>, %arg2: memref<9x1xf32, #tpu.memory_space<vmem>>, %arg3: memref<1x1xf32, #tpu.memory_space<smem>>, %arg4: memref<1x32xf32, #tpu.memory_space<vmem>>) attributes {dimension_semantics = [#tpu.dimension_semantics<parallel>], iteration_bounds = array<i64: 1>, scalar_prefetch = 0 : i64, scratch_operands = 0 : i64, tpu.core_type = #tpu.core_type<tc>, window_params = [{transform_indices = @transform_0, window_bounds = array<i64: 9, 32>}, {pipeline_mode = #tpu.pipeline_mode<synchronous>, transform_indices = @transform_1, window_bounds = array<i64: 9, 1>}, {transform_indices = @transform_2, window_bounds = array<i64: 1, 1>}, {transform_indices = @transform_3, window_bounds = array<i64: 1, 32>}]} {
    %c0 = arith.constant 0 : index
    %c0_0 = arith.constant 0 : index
    %0 = vector.load %arg1[%c0, %c0_0] : memref<9x32xf32, #tpu.memory_space<vmem>>, vector<9x32xf32>
    %c0_1 = arith.constant 0 : index
    %c0_2 = arith.constant 0 : index
    %1 = vector.load %arg2[%c0_1, %c0_2] : memref<9x1xf32, #tpu.memory_space<vmem>>, vector<9x1xf32>
    %c0_3 = arith.constant 0 : index
    %c0_4 = arith.constant 0 : index
    %2 = memref.load %arg3[%c0_3, %c0_4] : memref<1x1xf32, #tpu.memory_space<smem>>
    %3 = vector.broadcast %1 : vector<9x1xf32> to vector<9x32xf32>
    %4 = arith.mulf %0, %3 : vector<9x32xf32>
    %cst = arith.constant dense<0.000000e+00> : vector<32xf32>
    %5 = vector.multi_reduction <add>, %4, %cst [0] : vector<9x32xf32> to vector<32xf32>
    %6 = vector.shape_cast %5 : vector<32xf32> to vector<1x32xf32>
    %7 = vector.broadcast %2 : f32 to vector<1x32xf32>
    %8 = arith.addf %6, %7 : vector<1x32xf32>
    %9 = arith.negf %8 : vector<1x32xf32>
    %10 = math.exp %9 : vector<1x32xf32>
    %cst_5 = arith.constant 1.000000e+00 : f32
    %11 = vector.broadcast %cst_5 : f32 to vector<1x32xf32>
    %12 = arith.addf %11, %10 : vector<1x32xf32>
    %13 = arith.divf %11, %12 : vector<1x32xf32>
    %c0_6 = arith.constant 0 : index
    %c0_7 = arith.constant 0 : index
    %14 = vector.load %arg4[%c0_6, %c0_7] : memref<1x32xf32, #tpu.memory_space<vmem>>, vector<1x32xf32>
    tpu.vector_store %arg4[%c0_6, %c0_7], %13 {strides = array<i32>} : memref<1x32xf32, #tpu.memory_space<vmem>>, vector<1x32xf32>,
    return
  }
  func.func @transform_0(%arg0: i32) -> (i32, i32) {
    %c0_i32 = arith.constant 0 : i32
    %c0_i32_0 = arith.constant 0 : i32
    return %c0_i32, %arg0 : i32, i32
  }
  func.func @transform_1(%arg0: i32) -> (i32, i32) {
    %c0_i32 = arith.constant 0 : i32
    %c0_i32_0 = arith.constant 0 : i32
    %c0_i32_1 = arith.constant 0 : i32
    return %c0_i32, %c0_i32_0 : i32, i32
  }
  func.func @transform_2(%arg0: i32) -> (i32, i32) {
    %c0_i32 = arith.constant 0 : i32
    %c0_i32_0 = arith.constant 0 : i32
    %c0_i32_1 = arith.constant 0 : i32
    return %c0_i32, %c0_i32_0 : i32, i32
  }
  func.func @transform_3(%arg0: i32) -> (i32, i32) {
    %c0_i32 = arith.constant 0 : i32
    %c0_i32_0 = arith.constant 0 : i32
    return %c0_i32, %arg0 : i32, i32
  }
}

</mosaic_0001>

<bundles_post_ra>
// kernel: tpu_custom_call.1
= control target key start
LH: loop header
LB: loop body
LE: loop exit
PB: predicated region body
PF: predicated region fallthrough
CT: control target
= control target key end

     0   :  { %v99_v1 = vmov 0   ;;  %s150_s0 = inlined_call_operand.vmem [shape: f32[9,32], index: 0, kind: input, shape index: {}]   ;;  %s151_s1 = inlined_call_operand.vmem [shape: f32[9,1], index: 1, kind: input, shape index: {}]   ;;  %s152_s2 = inlined_call_operand.<no memory space> [shape: f32[1,1], index: 2, kind: input, shape index: {}]   ;;  %s153_s3 = inlined_call_operand.hbm [shape: f32[1,32], index: 3, kind: output, shape index: {}]  }
   0x1   :  { %v18_v0 = vld [vmem:[%s151_s1] sm:$0xff]  ;;  %70 = vset.pattern.permute.xlu0 %v99_v1 }
   0x2   :  { %9 = vsyncpa [#allocation4], 0  ;;  %23 = vperm.xlu0 %70, %v18_v0   ;;  %v19_v2 = vld [vmem:[%s151_s1 + $0x8] sm:$0x1]  ;;  %v16_v4 = vld [vmem:[%s150_s0] sm:$0xff]  ;;  %vm33_vm0 = vcmask 261120   ;;  %v44_v17 = vstv %s152_s2 }
   0x3   :  { %v17_v5 = vld [vmem:[%s150_s0 + $0x8] sm:$0x1]  ;;  %vm35_vm1 = vcmask 253952   ;;  %s100_s0 = smov [#allocation3]  }
   0x4   :  { %s59_s21 = sshll.u32 %s100_s0, 4  ;;  %s60_s21 = int_to_ptr.vmem [resolvable:$true] %s59_s21 }
   0x5   :  { %s75_s22 = scalar_lea.vmem %s60_s21, 16  ;;  %s79_s23 = scalar_lea.vmem %s60_s21, 32 }
   0x6   :  { %28 = vperm.xlu0 %70, %v19_v2   ;;  %p76_p0 = scmp.ne.s32.totalorder %s60_s21, %s75_s22  ;;  %p80_p1 = scmp.lt.s32.totalorder %s60_s21, %s60_s21 }
   0x7   :  { %p81_p2 = scmp.lt.s32.totalorder %s79_s23, %s75_s22 }
   0x9   :  { %p82_p3 = por %p81_p2, %p80_p1 }
   0xb   :  { %p83_p4 = pnand %p82_p3, %p76_p0 }
  0x81   :  { %v24_v3 = vpop.permute.xlu0 %23 }
  0x82   :  { %v31_v6 = vmul.f32 %v24_v3, %v16_v4 }
  0x84   :  { %v34_v9 = vsel %vm33_vm0, %v31_v6, 0.0 }
  0x85   :  { %v29_v7 = vpop.permute.xlu0 %28 }
  0x86   :  { %v32_v8 = vmul.f32 %v29_v7, %v17_v5 }
  0x88   :  { %v36_v10 = vsel %vm35_vm1, %v32_v8, 0.0 }
  0x89   :  { %v37_v11 = vadd.f32 %v36_v10, %v34_v9 }
  0x8b   :  { %v38_v12 = vrot.slane %v37_v11, 4 }
  0x8d   :  { %v39_v13 = vadd.f32 %v38_v12, %v37_v11 }
  0x8f   :  { %v40_v14 = vrot.slane %v39_v13, 2 }
  0x91   :  { %v41_v15 = vadd.f32 %v40_v14, %v39_v13 }
  0x93   :  { %v42_v16 = vrot.slane %v41_v15, 1 }
  0x95   :  { %v43_v18 = vadd.f32 %v42_v16, %v41_v15 }
  0x97   :  { %v45_v19 = vadd.f32 %v44_v17, %v43_v18 }
  0x99   :  { %v67_v20 = vmul.f32 -1.442695, %v45_v19 }
  0x9b   :  { %71 = vpow2.f32 %v67_v20 }
  0xa5   :  { %v72_v21 = vpop.eup %71 }
  0xa6   :  { %v49_v22 = vadd.f32 1.0, %v72_v21 }
  0xa8   :  { %73 = vrcp.f32 %v49_v22 }
  0xb2   :  { %v74_v23 = vpop.eup %73 }
  0xb3   :  { %52 = vst.msk [vmem:[#allocation3] sm:$0x1] %vm35_vm1, %v74_v23 }
  0xb4   :  { %86 = shalt.err (!%p83_p4)
}
  0xb5   :  { %s87_s25 = scalar_lea.hbm %s153_s3, 16 }
  0xb6   :  { %p88_p5 = scmp.ne.s32.totalorder %s153_s3, %s87_s25  ;;  %p91_p6 = scmp.lt.u32.totalorder %s87_s25, %s153_s3 }
  0xb8   :  { %p93_p7 = pnand %p91_p6, %p88_p5 }
  0xba   :  { %96 = shalt.err (!%p93_p7)
}
  0xbb   :  { %62 = dma.vmem_to_hbm [thread:$0]  %s60_s21, 16, %s153_s3, [#allocation4]  }
  0xbc   :  { %97 = dma.done.wait [#allocation4], 16  }
  0xbd   :  { %98 = vsyncadd [#allocation4], 4294967280 }
  0xbe   :  { %66 = vsyncpa [#allocation4], 1 }

</bundles_post_ra>
